<compile_context>
chip_gen: v7x
topology: tpu7x:2x2x1
jax: 0.10.0
libtpu: 0.0.40
codegen_flags: <defaults>
</compile_context>

<pallas_src>
import functools

import jax
import jax.numpy as jnp
from jax.experimental import pallas as pl
from jax.experimental.pallas import tpu as pltpu


# ----------------------------------------------------------------------------
# Tile-size helpers
# ----------------------------------------------------------------------------

def _pick_tile(dim, candidates):
    """Largest candidate evenly dividing `dim`; else the full dim (a
    full-extent block is always layout-legal)."""
    for t in candidates:
        if t <= dim and dim % t == 0:
            return t
    return dim


def _pick_head_group(num_heads, head_dim):
    """Smallest head group whose lane width (G*head_dim) is 128-aligned so the
    attention output block is lane-dense; fallback: all heads (== emb_dim)."""
    for g in range(1, num_heads + 1):
        if num_heads % g == 0 and (g * head_dim) % 128 == 0:
            return g
    return num_heads


# ----------------------------------------------------------------------------
# Tiled matmul kernel with optional fused LayerNorm prologue and fused
# bias / residual epilogue
# ----------------------------------------------------------------------------

def _matmul_kernel(x_ref, w_ref, *rest, has_ln, has_bias, has_res,
                   use_acc, single_k):
    if use_acc:
        o_ref, acc_ref = rest[-2], rest[-1]
        extras = rest[:-2]
    else:
        o_ref = rest[-1]
        acc_ref = rest[-1]        # f32 output block doubles as the accumulator
        extras = rest[:-1]

    x = x_ref[...]
    e_idx = 0
    if has_ln:
        # Fused LayerNorm (the x block spans the whole K row: tk == K).
        scale = extras[0][...].astype(jnp.float32)
        shift = extras[1][...].astype(jnp.float32)
        e_idx = 2
        xf = x.astype(jnp.float32)
        mean = jnp.mean(xf, axis=-1, keepdims=True)
        var = jnp.mean(jnp.square(xf - mean), axis=-1, keepdims=True)  # biased
        x = (scale * ((xf - mean) * jax.lax.rsqrt(var + 1e-5)) + shift
             ).astype(jnp.bfloat16)

    part = jnp.dot(x, w_ref[...], preferred_element_type=jnp.float32)

    def _epilogue(out):
        i = e_idx
        if has_bias:
            out = out + extras[i][...].astype(jnp.float32)
            i += 1
        if has_res:
            out = out + extras[i][...].astype(jnp.float32)
        return out

    if single_k:
        o_ref[...] = _epilogue(part).astype(o_ref.dtype)
    else:
        k = pl.program_id(2)

        @pl.when(k == 0)
        def _init():
            acc_ref[...] = jnp.zeros_like(acc_ref)

        acc_ref[...] += part

        if use_acc or has_bias or has_res:
            @pl.when(k == pl.num_programs(2) - 1)
            def _finalize():
                o_ref[...] = _epilogue(acc_ref[...]).astype(o_ref.dtype)


def matmul(x, w, bias=None, residual=None, ln_scale=None, ln_shift=None,
           out_dtype=jnp.float32, out_parts=1):
    """Tiled [LN](x) @ w (+ bias) (+ residual).  bf16 MXU feeds, f32 accumulate.

    x: (M, K); w: (K, N); bias: (N,) or None; residual: (M, N) or None.
    ln_scale/ln_shift: (K,) LayerNorm params fused into the GEMM prologue.
    If out_parts > 1 the N axis is split into equal chunks and the result is
    written as (out_parts, M, N // out_parts) purely via the output index_map
    (used for the fused QKV projection, no extra HBM copies).
    """
    M, K = x.shape
    K2, N = w.shape
    assert K == K2 and N % out_parts == 0
    has_ln = ln_scale is not None
    Np = N // out_parts

    w = w.astype(jnp.bfloat16)
    if has_ln:
        tk = K                               # LN needs the full K row per tile
    else:
        x = x.astype(jnp.bfloat16)
        tk = _pick_tile(K, (2048, 1024, 512, 256, 128))

    tm = _pick_tile(M, (512, 256, 128, 64, 32, 16, 8))
    tn = _pick_tile(Np if out_parts > 1 else N, (512, 256, 128))
    if out_parts > 1:
        # per-part split is plumbed through the output index_map; caller
        # guarantees each part (= emb_dim) is 128-aligned.
        assert Np % tn == 0 and tn % 128 == 0
    njp = max(Np // tn, 1)
    gk = K // tk
    grid = (M // tm, N // tn, gk)
    single_k = gk == 1
    use_acc = (not single_k) and (out_dtype != jnp.float32)

    in_specs = [pl.BlockSpec((tm, tk), lambda i, j, k: (i, k)),
                pl.BlockSpec((tk, tn), lambda i, j, k: (k, j))]
    args = [x, w]
    if has_ln:
        in_specs += [pl.BlockSpec((1, K), lambda i, j, k: (0, 0)),
                     pl.BlockSpec((1, K), lambda i, j, k: (0, 0))]
        args += [ln_scale.reshape(1, K).astype(jnp.float32),
                 ln_shift.reshape(1, K).astype(jnp.float32)]
    if bias is not None:
        in_specs.append(pl.BlockSpec((1, tn), lambda i, j, k: (0, j)))
        args.append(bias.reshape(1, N).astype(jnp.float32))
    if residual is not None:
        assert out_parts == 1
        in_specs.append(pl.BlockSpec((tm, tn), lambda i, j, k: (i, j)))
        args.append(residual.astype(jnp.float32))

    if out_parts == 1:
        out_shape = jax.ShapeDtypeStruct((M, N), out_dtype)
        out_spec = pl.BlockSpec((tm, tn), lambda i, j, k: (i, j))
    else:
        out_shape = jax.ShapeDtypeStruct((out_parts, M, Np), out_dtype)
        out_spec = pl.BlockSpec((None, tm, tn),
                                lambda i, j, k: (j // njp, i, j % njp))

    scratch = [pltpu.VMEM((tm, tn), jnp.float32)] if use_acc else []

    nbytes = (x.size * x.dtype.itemsize + w.size * 2
              + M * N * jnp.dtype(out_dtype).itemsize
              + (0 if bias is None else N * 4)
              + (0 if residual is None else M * N * 4))
    kern = functools.partial(_matmul_kernel, has_ln=has_ln,
                             has_bias=bias is not None,
                             has_res=residual is not None,
                             use_acc=use_acc, single_k=single_k)
    return pl.pallas_call(
        kern,
        out_shape=out_shape,
        grid=grid,
        in_specs=in_specs,
        out_specs=out_spec,
        scratch_shapes=scratch,
        compiler_params=pltpu.CompilerParams(
            dimension_semantics=("parallel", "parallel", "arbitrary"),
            vmem_limit_bytes=48 * 1024 * 1024),
        cost_estimate=pl.CostEstimate(flops=2 * M * N * K, transcendentals=0,
                                      bytes_accessed=nbytes),
    )(*args)


# ----------------------------------------------------------------------------
# Attention core: grid over (batch, head_group), lane-dense output block
# ----------------------------------------------------------------------------

def _attn_kernel(qkv_ref, o_ref, *, heads, head_dim):
    # qkv block: (3, 1, T, G*hd) bf16 for one (batch, head_group) tile.
    # 1/sqrt(head_dim) is already folded into the Q weight columns at init.
    G, hd = heads, head_dim
    T = qkv_ref.shape[2]
    rows = jax.lax.broadcasted_iota(jnp.int32, (T, 1), 0)
    cols = jax.lax.broadcasted_iota(jnp.int32, (1, T), 1)
    causal = cols > rows                      # (T, T) bool via broadcast compare
    for g in range(G):                        # static unroll over grouped heads
        sl = slice(g * hd, (g + 1) * hd)
        q = qkv_ref[0, 0, :, sl]              # (T, hd) bf16
        k = qkv_ref[1, 0, :, sl]
        v = qkv_ref[2, 0, :, sl]
        # Contract head_dim directly: no k.T relayout in front of the MXU.
        s = jax.lax.dot_general(q, k, (((1,), (1,)), ((), ())),
                                preferred_element_type=jnp.float32)   # (T, T)
        s = jnp.where(causal, -jnp.inf, s)    # causal (triu, diag=1); diag kept
        m = jnp.max(s, axis=-1, keepdims=True)
        e = jnp.exp(s - m)
        denom = jnp.sum(e, axis=-1, keepdims=True)
        p = (e * pl.reciprocal(denom, approx=True)).astype(v.dtype)
        # Write each head's context straight into its output slice.
        o_ref[0, :, sl] = jnp.dot(p, v, preferred_element_type=jnp.float32
                                  ).astype(o_ref.dtype)


def attention_core(qkv, num_heads, head_dim):
    """qkv: (3, B, T, D) bf16 with D == num_heads*head_dim -> (B, T, D) bf16."""
    _, B, T, D = qkv.shape
    G = _pick_head_group(num_heads, head_dim)
    n_groups = num_heads // G
    gw = G * head_dim
    kern = functools.partial(_attn_kernel, heads=G, head_dim=head_dim)
    return pl.pallas_call(
        kern,
        out_shape=jax.ShapeDtypeStruct((B, T, D), jnp.bfloat16),
        grid=(B, n_groups),
        in_specs=[pl.BlockSpec((3, 1, T, gw), lambda b, g: (0, b, 0, g))],
        out_specs=pl.BlockSpec((1, T, gw), lambda b, g: (b, 0, g)),
        compiler_params=pltpu.CompilerParams(
            dimension_semantics=("parallel", "parallel"),
            vmem_limit_bytes=48 * 1024 * 1024),
    )(qkv)


# ----------------------------------------------------------------------------
# Model (embedding gather + reshapes as plain-JAX glue, hot paths in kernels)
# ----------------------------------------------------------------------------

def multi_head_attention(x2d, ln_scale, ln_shift, blk, B, T, D, H, hd):
    """x2d: raw residual-stream activations (B*T, D) f32.  Computes
    out_proj(attn(LayerNorm(x2d))) + bias + x2d, f32 (B*T, D).  LayerNorm is
    fused into the QKV GEMM; the residual add into the out-proj epilogue."""
    M = B * T
    if D % 128 == 0:
        # fused LN + QKV GEMM writing (3, M, D) directly via the output index_map
        qkv = matmul(x2d, blk['w_qkv'], ln_scale=ln_scale, ln_shift=ln_shift,
                     out_dtype=jnp.bfloat16, out_parts=3)
        qkv = qkv.reshape(3, B, T, D)
    else:
        # small-D fallback (toy shapes): fused LN + QKV GEMM + tiny host relayout
        qkv = matmul(x2d, blk['w_qkv'], ln_scale=ln_scale, ln_shift=ln_shift,
                     out_dtype=jnp.bfloat16)
        qkv = jnp.transpose(qkv.reshape(B, T, 3, D), (2, 0, 1, 3))
    ctx = attention_core(qkv, H, hd)                        # (B, T, D) bf16
    out = matmul(ctx.reshape(M, D), blk['wo'], bias=blk['bo'],
                 residual=x2d, out_dtype=jnp.float32)
    return out


def transformer_block(x2d, blk, B, T, D, H, hd):
    # sub-block 1: norm1 -> attn -> (+shortcut), LN fused into the QKV GEMM
    x2d = multi_head_attention(x2d, blk['ln1_scale'], blk['ln1_shift'],
                               blk, B, T, D, H, hd)
    # sub-block 2: reference forward applies self.attn AGAIN (not self.ff)
    x2d = multi_head_attention(x2d, blk['ln2_scale'], blk['ln2_shift'],
                               blk, B, T, D, H, hd)
    return x2d


def gpt_forward(params, in_idx, cfg):
    B, T = in_idx.shape
    D, H, V = cfg['emb_dim'], cfg['n_heads'], cfg['vocab_size']
    hd = D // H
    tok = params['tok_emb'][in_idx]                 # (B, T, D) gather (glue)
    pos = params['pos_emb'][:T]                     # (T, D)
    x2d = (tok + pos[None, :, :]).reshape(B * T, D)  # drop_emb: identity
    for blk in params['blocks']:
        x2d = transformer_block(x2d, blk, B, T, D, H, hd)
    # final LN fused into the (128-padded) vocab projection; slice back to V.
    logits = matmul(x2d, params['out_head'],
                    ln_scale=params['final_scale'],
                    ln_shift=params['final_shift'],
                    out_dtype=jnp.float32)
    return logits[:, :V].reshape(B, T, V)


def init_params(key, cfg):
    D, V = cfg['emb_dim'], cfg['vocab_size']
    C, L, H = cfg['context_length'], cfg['n_layers'], cfg['n_heads']
    hd = D // H
    std = 0.02
    V_pad = ((V + 127) // 128) * 128           # lane-dense vocab projection
    keys = jax.random.split(key, 3 + L)
    out_head = std * jax.random.normal(keys[2], (D, V), jnp.float32)
    if V_pad != V:
        out_head = jnp.pad(out_head, ((0, 0), (0, V_pad - V)))
    params = {
        'tok_emb': std * jax.random.normal(keys[0], (V, D), jnp.float32),
        'pos_emb': std * jax.random.normal(keys[1], (C, D), jnp.float32),
        'final_scale': jnp.ones((D,), jnp.float32),
        'final_shift': jnp.zeros((D,), jnp.float32),
        # matmul weights stored pre-transposed (in, out) and in bf16 (MXU feed)
        'out_head': out_head.astype(jnp.bfloat16),
        'blocks': [],
    }
    for l in range(L):
        k = jax.random.split(keys[3 + l], 8)
        # fold the 1/sqrt(head_dim) softmax scale into the Q weight columns
        wq = (std * jax.random.normal(k[0], (D, D), jnp.float32)
              ) * (1.0 / float(hd) ** 0.5)
        wk = std * jax.random.normal(k[1], (D, D), jnp.float32)
        wv = std * jax.random.normal(k[2], (D, D), jnp.float32)
        blk = {
            'ln1_scale': jnp.ones((D,), jnp.float32),
            'ln1_shift': jnp.zeros((D,), jnp.float32),
            'ln2_scale': jnp.ones((D,), jnp.float32),
            'ln2_shift': jnp.zeros((D,), jnp.float32),
            # fused QKV weight: concat([Wq*scale | Wk | Wv], axis=1) -> (D, 3D)
            'w_qkv': jnp.concatenate([wq, wk, wv], axis=1).astype(jnp.bfloat16),
            'wo': (std * jax.random.normal(k[3], (D, D), jnp.float32)
                   ).astype(jnp.bfloat16),
            'bo': std * jax.random.normal(k[4], (D,), jnp.float32),
            # FeedForward params exist in the reference __init__ but are unused
            # in its forward (TransformerBlock calls attn twice); kept for parity.
            'w_ff1': (std * jax.random.normal(k[5], (D, 4 * D), jnp.float32)
                      ).astype(jnp.bfloat16),
            'b_ff1': jnp.zeros((4 * D,), jnp.float32),
            'w_ff2': (std * jax.random.normal(k[6], (4 * D, D), jnp.float32)
                      ).astype(jnp.bfloat16),
            'b_ff2': jnp.zeros((D,), jnp.float32),
        }
        params['blocks'].append(blk)
    return params


# ----------------------------------------------------------------------------
# Pure-JAX reference (same folded/padded params, same twice-attention forward)
# ----------------------------------------------------------------------------

def _ref_layernorm(x, scale, shift):
    mean = x.mean(-1, keepdims=True)
    var = jnp.square(x - mean).mean(-1, keepdims=True)
    return scale * (x - mean) / jnp.sqrt(var + 1e-5) + shift


def _ref_attention(x, blk, H, hd):
    B, T, D = x.shape
    qkv = x @ blk['w_qkv'].astype(jnp.float32)               # (B, T, 3D)
    q, k, v = jnp.split(qkv, 3, axis=-1)
    def heads(a):
        return a.reshape(B, T, H, hd).transpose(0, 2, 1, 3)
    q, k, v = heads(q), heads(k), heads(v)
    s = jnp.einsum('bhqd,bhkd->bhqk', q, k)                  # scale pre-folded
    mask = jnp.triu(jnp.ones((T, T), bool), k=1)
    s = jnp.where(mask, -jnp.inf, s)
    p = jax.nn.softmax(s, axis=-1)
    ctx = jnp.einsum('bhqk,bhkd->bhqd', p, v).transpose(0, 2, 1, 3)
    ctx = ctx.reshape(B, T, D)
    return ctx @ blk['wo'].astype(jnp.float32) + blk['bo']


def ref_forward(params, in_idx, cfg):
    B, T = in_idx.shape
    D, H, V = cfg['emb_dim'], cfg['n_heads'], cfg['vocab_size']
    hd = D // H
    x = params['tok_emb'][in_idx] + params['pos_emb'][:T][None]
    for blk in params['blocks']:
        sc = x
        x = _ref_attention(_ref_layernorm(x, blk['ln1_scale'], blk['ln1_shift']),
                           blk, H, hd) + sc
        sc = x
        x = _ref_attention(_ref_layernorm(x, blk['ln2_scale'], blk['ln2_shift']),
                           blk, H, hd) + sc
    x = _ref_layernorm(x, params['final_scale'], params['final_shift'])
    logits = x @ params['out_head'].astype(jnp.float32)
    return logits[..., :V]


if __name__ == "__main__":
    def run(cfg, B, T):
        key = jax.random.PRNGKey(0)
        pkey, ikey = jax.random.split(key)
        params = init_params(pkey, cfg)
        in_idx = jax.random.randint(ikey, (B, T), 0, cfg['vocab_size'],
                                    dtype=jnp.int32)
        fwd = jax.jit(functools.partial(gpt_forward, cfg=cfg))
        logits = fwd(params, in_idx)
        jax.block_until_ready(logits)
        assert logits.shape == (B, T, cfg['vocab_size'])
        assert logits.dtype == jnp.float32
        ref = ref_forward(params, in_idx, cfg)
        err = float(jnp.max(jnp.abs(logits - ref)))
        assert err < 5e-2, f"kernel vs reference mismatch: max abs err = {err}"

    # toy config (same as the module's small-shape usage)
    cfg_small = dict(vocab_size=128, context_length=16, emb_dim=32, n_heads=4,
                     n_layers=2, drop_rate=0.0, qkv_bias=False)
    run(cfg_small, B=2, T=8)

    # 128-aligned config: exercises the fused-QKV (out_parts) output index_map,
    # grouped-head attention, and the multi-step-K direct f32 accumulation path.
    cfg_aligned = dict(vocab_size=256, context_length=16, emb_dim=384,
                       n_heads=6, n_layers=1, drop_rate=0.0, qkv_bias=False)
    run(cfg_aligned, B=2, T=16)

    print("KERNEL_OK")
</pallas_src>

<mosaic_0001>
module attributes {stable_mosaic.version = 11 : i64} {
  func.func @_matmul_kernel(%arg0: i32, %arg1: i32, %arg2: i32, %arg3: memref<16x32xf32, #tpu.memory_space<vmem>>, %arg4: memref<32x96xbf16, #tpu.memory_space<vmem>>, %arg5: memref<1x32xf32, #tpu.memory_space<vmem>>, %arg6: memref<1x32xf32, #tpu.memory_space<vmem>>, %arg7: memref<16x96xbf16, #tpu.memory_space<vmem>>) attributes {dimension_semantics = [#tpu.dimension_semantics<parallel>, #tpu.dimension_semantics<parallel>, #tpu.dimension_semantics<arbitrary>], iteration_bounds = array<i64: 1, 1, 1>, scalar_prefetch = 0 : i64, scratch_operands = 0 : i64, tpu.core_type = #tpu.core_type<tc>, window_params = [{transform_indices = @transform_0, window_bounds = array<i64: 16, 32>}, {transform_indices = @transform_1, window_bounds = array<i64: 32, 96>}, {pipeline_mode = #tpu.pipeline_mode<synchronous>, transform_indices = @transform_2, window_bounds = array<i64: 1, 32>}, {pipeline_mode = #tpu.pipeline_mode<synchronous>, transform_indices = @transform_3, window_bounds = array<i64: 1, 32>}, {transform_indices = @transform_4, window_bounds = array<i64: 16, 96>}]} {
    %c0 = arith.constant 0 : index
    %c0_0 = arith.constant 0 : index
    %0 = vector.load %arg3[%c0, %c0_0] : memref<16x32xf32, #tpu.memory_space<vmem>>, vector<16x32xf32>
    %c0_1 = arith.constant 0 : index
    %c0_2 = arith.constant 0 : index
    %1 = vector.load %arg5[%c0_1, %c0_2] : memref<1x32xf32, #tpu.memory_space<vmem>>, vector<1x32xf32>
    %c0_3 = arith.constant 0 : index
    %c0_4 = arith.constant 0 : index
    %2 = vector.load %arg6[%c0_3, %c0_4] : memref<1x32xf32, #tpu.memory_space<vmem>>, vector<1x32xf32>
    %cst = arith.constant dense<0.000000e+00> : vector<16xf32>
    %3 = vector.multi_reduction <add>, %0, %cst [1] : vector<16x32xf32> to vector<16xf32>
    %4 = vector.shape_cast %3 : vector<16xf32> to vector<16x1xf32>
    %cst_5 = arith.constant 3.200000e+01 : f32
    %5 = vector.broadcast %cst_5 : f32 to vector<16x1xf32>
    %6 = arith.divf %4, %5 : vector<16x1xf32>
    %7 = vector.broadcast %6 : vector<16x1xf32> to vector<16x32xf32>
    %8 = arith.subf %0, %7 : vector<16x32xf32>
    %9 = arith.mulf %8, %8 : vector<16x32xf32>
    %cst_6 = arith.constant dense<0.000000e+00> : vector<16xf32>
    %10 = vector.multi_reduction <add>, %9, %cst_6 [1] : vector<16x32xf32> to vector<16xf32>
    %11 = vector.shape_cast %10 : vector<16xf32> to vector<16x1xf32>
    %cst_7 = arith.constant 3.200000e+01 : f32
    %12 = vector.broadcast %cst_7 : f32 to vector<16x1xf32>
    %13 = arith.divf %11, %12 : vector<16x1xf32>
    %14 = vector.broadcast %6 : vector<16x1xf32> to vector<16x32xf32>
    %15 = arith.subf %0, %14 : vector<16x32xf32>
    %cst_8 = arith.constant 9.99999974E-6 : f32
    %16 = vector.broadcast %cst_8 : f32 to vector<16x1xf32>
    %17 = arith.addf %13, %16 : vector<16x1xf32>
    %18 = math.rsqrt %17 : vector<16x1xf32>
    %19 = vector.broadcast %18 : vector<16x1xf32> to vector<16x32xf32>
    %20 = arith.mulf %15, %19 : vector<16x32xf32>
    %21 = vector.broadcast %1 : vector<1x32xf32> to vector<16x32xf32>
    %22 = arith.mulf %21, %20 : vector<16x32xf32>
    %23 = vector.broadcast %2 : vector<1x32xf32> to vector<16x32xf32>
    %24 = arith.addf %22, %23 : vector<16x32xf32>
    %25 = arith.truncf %24 : vector<16x32xf32> to vector<16x32xbf16>
    %c0_9 = arith.constant 0 : index
    %c0_10 = arith.constant 0 : index
    %26 = vector.load %arg4[%c0_9, %c0_10] : memref<32x96xbf16, #tpu.memory_space<vmem>>, vector<32x96xbf16>
    %cst_11 = arith.constant dense<0.000000e+00> : vector<16x96xf32>
    %27 = tpu.matmul %25, %26, %cst_11 {dimension_numbers = #tpu.dot_dimension_numbers<[1], [0], [0], [1], [0, 0, 1, 1], [], []>} : vector<16x32xbf16>, vector<32x96xbf16>, vector<16x96xf32> -> vector<16x96xf32>
    %28 = arith.truncf %27 : vector<16x96xf32> to vector<16x96xbf16>
    %c0_12 = arith.constant 0 : index
    %c0_13 = arith.constant 0 : index
    %29 = vector.load %arg7[%c0_12, %c0_13] : memref<16x96xbf16, #tpu.memory_space<vmem>>, vector<16x96xbf16>
    tpu.vector_store %arg7[%c0_12, %c0_13], %28 {strides = array<i32>} : memref<16x96xbf16, #tpu.memory_space<vmem>>, vector<16x96xbf16>,
    return
  }
  func.func @transform_0(%arg0: i32, %arg1: i32, %arg2: i32) -> (i32, i32) {
    %c0_i32 = arith.constant 0 : i32
    return %arg0, %arg2 : i32, i32
  }
  func.func @transform_1(%arg0: i32, %arg1: i32, %arg2: i32) -> (i32, i32) {
    %c0_i32 = arith.constant 0 : i32
    return %arg2, %arg1 : i32, i32
  }
  func.func @transform_2(%arg0: i32, %arg1: i32, %arg2: i32) -> (i32, i32) {
    %c0_i32 = arith.constant 0 : i32
    %c0_i32_0 = arith.constant 0 : i32
    %c0_i32_1 = arith.constant 0 : i32
    return %c0_i32, %c0_i32_0 : i32, i32
  }
  func.func @transform_3(%arg0: i32, %arg1: i32, %arg2: i32) -> (i32, i32) {
    %c0_i32 = arith.constant 0 : i32
    %c0_i32_0 = arith.constant 0 : i32
    %c0_i32_1 = arith.constant 0 : i32
    return %c0_i32, %c0_i32_0 : i32, i32
  }
  func.func @transform_4(%arg0: i32, %arg1: i32, %arg2: i32) -> (i32, i32) {
    %c0_i32 = arith.constant 0 : i32
    return %arg0, %arg1 : i32, i32
  }
}

module attributes {stable_mosaic.version = 11 : i64} {
  func.func @_attn_kernel(%arg0: i32, %arg1: i32, %arg2: memref<3x1x8x32xbf16, #tpu.memory_space<vmem>>, %arg3: memref<1x8x32xbf16, #tpu.memory_space<vmem>>) attributes {dimension_semantics = [#tpu.dimension_semantics<parallel>, #tpu.dimension_semantics<parallel>], iteration_bounds = array<i64: 2, 1>, scalar_prefetch = 0 : i64, scratch_operands = 0 : i64, tpu.core_type = #tpu.core_type<tc>, window_params = [{transform_indices = @transform_0, window_bounds = array<i64: 3, 1, 8, 32>}, {transform_indices = @transform_1, window_bounds = array<i64: 1, 8, 32>}]} {
    %0 = tpu.iota {dimensions = array<i32: 0>} : vector<8x1xi32>
    %1 = tpu.iota {dimensions = array<i32: 1>} : vector<1x8xi32>
    %2 = vector.broadcast %1 : vector<1x8xi32> to vector<8x8xi32>
    %3 = vector.broadcast %0 : vector<8x1xi32> to vector<8x8xi32>
    %4 = arith.cmpi sgt, %2, %3 : vector<8x8xi32>
    %c0 = arith.constant 0 : index
    %c0_0 = arith.constant 0 : index
    %c0_1 = arith.constant 0 : index
    %c0_2 = arith.constant 0 : index
    %5 = vector.load %arg2[%c0, %c0_0, %c0_1, %c0_2] : memref<3x1x8x32xbf16, #tpu.memory_space<vmem>>, vector<1x1x8x8xbf16>
    %6 = vector.shape_cast %5 : vector<1x1x8x8xbf16> to vector<8x8xbf16>
    %c1 = arith.constant 1 : index
    %c0_3 = arith.constant 0 : index
    %c0_4 = arith.constant 0 : index
    %c0_5 = arith.constant 0 : index
    %7 = vector.load %arg2[%c1, %c0_3, %c0_4, %c0_5] : memref<3x1x8x32xbf16, #tpu.memory_space<vmem>>, vector<1x1x8x8xbf16>
    %8 = vector.shape_cast %7 : vector<1x1x8x8xbf16> to vector<8x8xbf16>
    %c2 = arith.constant 2 : index
    %c0_6 = arith.constant 0 : index
    %c0_7 = arith.constant 0 : index
    %c0_8 = arith.constant 0 : index
    %9 = vector.load %arg2[%c2, %c0_6, %c0_7, %c0_8] : memref<3x1x8x32xbf16, #tpu.memory_space<vmem>>, vector<1x1x8x8xbf16>
    %10 = vector.shape_cast %9 : vector<1x1x8x8xbf16> to vector<8x8xbf16>
    %cst = arith.constant dense<0.000000e+00> : vector<8x8xf32>
    %11 = tpu.matmul %6, %8, %cst {dimension_numbers = #tpu.dot_dimension_numbers<[1], [1], [0], [0], [0, 0, 1, 0], [], []>} : vector<8x8xbf16>, vector<8x8xbf16>, vector<8x8xf32> -> vector<8x8xf32>
    %cst_9 = arith.constant 0xFF800000 : f32
    %12 = vector.broadcast %cst_9 : f32 to vector<8x8xf32>
    %13 = arith.select %4, %12, %11 : vector<8x8xi1>, vector<8x8xf32>
    %cst_10 = arith.constant dense<0xFF800000> : vector<8xf32>
    %14 = vector.multi_reduction <maximumf>, %13, %cst_10 [1] : vector<8x8xf32> to vector<8xf32>
    %15 = vector.shape_cast %14 : vector<8xf32> to vector<8x1xf32>
    %16 = vector.broadcast %15 : vector<8x1xf32> to vector<8x8xf32>
    %17 = arith.subf %13, %16 : vector<8x8xf32>
    %18 = math.exp %17 : vector<8x8xf32>
    %cst_11 = arith.constant dense<0.000000e+00> : vector<8xf32>
    %19 = vector.multi_reduction <add>, %18, %cst_11 [1] : vector<8x8xf32> to vector<8xf32>
    %20 = vector.shape_cast %19 : vector<8xf32> to vector<8x1xf32>
    %21 = tpu.reciprocal %20 {approx = true} : vector<8x1xf32> -> vector<8x1xf32>
    %22 = vector.broadcast %21 : vector<8x1xf32> to vector<8x8xf32>
    %23 = arith.mulf %18, %22 : vector<8x8xf32>
    %24 = arith.truncf %23 : vector<8x8xf32> to vector<8x8xbf16>
    %cst_12 = arith.constant dense<0.000000e+00> : vector<8x8xf32>
    %25 = tpu.matmul %24, %10, %cst_12 {dimension_numbers = #tpu.dot_dimension_numbers<[1], [0], [0], [1], [0, 0, 1, 1], [], []>} : vector<8x8xbf16>, vector<8x8xbf16>, vector<8x8xf32> -> vector<8x8xf32>
    %26 = arith.truncf %25 : vector<8x8xf32> to vector<8x8xbf16>
    %c0_13 = arith.constant 0 : index
    %c0_14 = arith.constant 0 : index
    %c0_15 = arith.constant 0 : index
    %27 = vector.load %arg3[%c0_13, %c0_14, %c0_15] : memref<1x8x32xbf16, #tpu.memory_space<vmem>>, vector<1x8x8xbf16>
    %28 = vector.shape_cast %27 : vector<1x8x8xbf16> to vector<8x8xbf16>
    %29 = vector.shape_cast %26 : vector<8x8xbf16> to vector<1x8x8xbf16>
    tpu.vector_store %arg3[%c0_13, %c0_14, %c0_15], %29 {strides = array<i32>} : memref<1x8x32xbf16, #tpu.memory_space<vmem>>, vector<1x8x8xbf16>,
    %c0_16 = arith.constant 0 : index
    %c0_17 = arith.constant 0 : index
    %c0_18 = arith.constant 0 : index
    %c8 = arith.constant 8 : index
    %30 = vector.load %arg2[%c0_16, %c0_17, %c0_18, %c8] : memref<3x1x8x32xbf16, #tpu.memory_space<vmem>>, vector<1x1x8x8xbf16>
    %31 = vector.shape_cast %30 : vector<1x1x8x8xbf16> to vector<8x8xbf16>
    %c1_19 = arith.constant 1 : index
    %c0_20 = arith.constant 0 : index
    %c0_21 = arith.constant 0 : index
    %c8_22 = arith.constant 8 : index
    %32 = vector.load %arg2[%c1_19, %c0_20, %c0_21, %c8_22] : memref<3x1x8x32xbf16, #tpu.memory_space<vmem>>, vector<1x1x8x8xbf16>
    %33 = vector.shape_cast %32 : vector<1x1x8x8xbf16> to vector<8x8xbf16>
    %c2_23 = arith.constant 2 : index
    %c0_24 = arith.constant 0 : index
    %c0_25 = arith.constant 0 : index
    %c8_26 = arith.constant 8 : index
    %34 = vector.load %arg2[%c2_23, %c0_24, %c0_25, %c8_26] : memref<3x1x8x32xbf16, #tpu.memory_space<vmem>>, vector<1x1x8x8xbf16>
    %35 = vector.shape_cast %34 : vector<1x1x8x8xbf16> to vector<8x8xbf16>
    %cst_27 = arith.constant dense<0.000000e+00> : vector<8x8xf32>
    %36 = tpu.matmul %31, %33, %cst_27 {dimension_numbers = #tpu.dot_dimension_numbers<[1], [1], [0], [0], [0, 0, 1, 0], [], []>} : vector<8x8xbf16>, vector<8x8xbf16>, vector<8x8xf32> -> vector<8x8xf32>
    %cst_28 = arith.constant 0xFF800000 : f32
    %37 = vector.broadcast %cst_28 : f32 to vector<8x8xf32>
    %38 = arith.select %4, %37, %36 : vector<8x8xi1>, vector<8x8xf32>
    %cst_29 = arith.constant dense<0xFF800000> : vector<8xf32>
    %39 = vector.multi_reduction <maximumf>, %38, %cst_29 [1] : vector<8x8xf32> to vector<8xf32>
    %40 = vector.shape_cast %39 : vector<8xf32> to vector<8x1xf32>
    %41 = vector.broadcast %40 : vector<8x1xf32> to vector<8x8xf32>
    %42 = arith.subf %38, %41 : vector<8x8xf32>
    %43 = math.exp %42 : vector<8x8xf32>
    %cst_30 = arith.constant dense<0.000000e+00> : vector<8xf32>
    %44 = vector.multi_reduction <add>, %43, %cst_30 [1] : vector<8x8xf32> to vector<8xf32>
    %45 = vector.shape_cast %44 : vector<8xf32> to vector<8x1xf32>
    %46 = tpu.reciprocal %45 {approx = true} : vector<8x1xf32> -> vector<8x1xf32>
    %47 = vector.broadcast %46 : vector<8x1xf32> to vector<8x8xf32>
    %48 = arith.mulf %43, %47 : vector<8x8xf32>
    %49 = arith.truncf %48 : vector<8x8xf32> to vector<8x8xbf16>
    %cst_31 = arith.constant dense<0.000000e+00> : vector<8x8xf32>
    %50 = tpu.matmul %49, %35, %cst_31 {dimension_numbers = #tpu.dot_dimension_numbers<[1], [0], [0], [1], [0, 0, 1, 1], [], []>} : vector<8x8xbf16>, vector<8x8xbf16>, vector<8x8xf32> -> vector<8x8xf32>
    %51 = arith.truncf %50 : vector<8x8xf32> to vector<8x8xbf16>
    %c0_32 = arith.constant 0 : index
    %c0_33 = arith.constant 0 : index
    %c8_34 = arith.constant 8 : index
    %52 = vector.load %arg3[%c0_32, %c0_33, %c8_34] : memref<1x8x32xbf16, #tpu.memory_space<vmem>>, vector<1x8x8xbf16>
    %53 = vector.shape_cast %52 : vector<1x8x8xbf16> to vector<8x8xbf16>
    %54 = vector.shape_cast %51 : vector<8x8xbf16> to vector<1x8x8xbf16>
    tpu.vector_store %arg3[%c0_32, %c0_33, %c8_34], %54 {strides = array<i32>} : memref<1x8x32xbf16, #tpu.memory_space<vmem>>, vector<1x8x8xbf16>,
    %c0_35 = arith.constant 0 : index
    %c0_36 = arith.constant 0 : index
    %c0_37 = arith.constant 0 : index
    %c16 = arith.constant 16 : index
    %55 = vector.load %arg2[%c0_35, %c0_36, %c0_37, %c16] : memref<3x1x8x32xbf16, #tpu.memory_space<vmem>>, vector<1x1x8x8xbf16>
    %56 = vector.shape_cast %55 : vector<1x1x8x8xbf16> to vector<8x8xbf16>
    %c1_38 = arith.constant 1 : index
    %c0_39 = arith.constant 0 : index
    %c0_40 = arith.constant 0 : index
    %c16_41 = arith.constant 16 : index
    %57 = vector.load %arg2[%c1_38, %c0_39, %c0_40, %c16_41] : memref<3x1x8x32xbf16, #tpu.memory_space<vmem>>, vector<1x1x8x8xbf16>
    %58 = vector.shape_cast %57 : vector<1x1x8x8xbf16> to vector<8x8xbf16>
    %c2_42 = arith.constant 2 : index
    %c0_43 = arith.constant 0 : index
    %c0_44 = arith.constant 0 : index
    %c16_45 = arith.constant 16 : index
    %59 = vector.load %arg2[%c2_42, %c0_43, %c0_44, %c16_45] : memref<3x1x8x32xbf16, #tpu.memory_space<vmem>>, vector<1x1x8x8xbf16>
    %60 = vector.shape_cast %59 : vector<1x1x8x8xbf16> to vector<8x8xbf16>
    %cst_46 = arith.constant dense<0.000000e+00> : vector<8x8xf32>
    %61 = tpu.matmul %56, %58, %cst_46 {dimension_numbers = #tpu.dot_dimension_numbers<[1], [1], [0], [0], [0, 0, 1, 0], [], []>} : vector<8x8xbf16>, vector<8x8xbf16>, vector<8x8xf32> -> vector<8x8xf32>
    %cst_47 = arith.constant 0xFF800000 : f32
    %62 = vector.broadcast %cst_47 : f32 to vector<8x8xf32>
    %63 = arith.select %4, %62, %61 : vector<8x8xi1>, vector<8x8xf32>
    %cst_48 = arith.constant dense<0xFF800000> : vector<8xf32>
    %64 = vector.multi_reduction <maximumf>, %63, %cst_48 [1] : vector<8x8xf32> to vector<8xf32>
    %65 = vector.shape_cast %64 : vector<8xf32> to vector<8x1xf32>
    %66 = vector.broadcast %65 : vector<8x1xf32> to vector<8x8xf32>
    %67 = arith.subf %63, %66 : vector<8x8xf32>
    %68 = math.exp %67 : vector<8x8xf32>
    %cst_49 = arith.constant dense<0.000000e+00> : vector<8xf32>
    %69 = vector.multi_reduction <add>, %68, %cst_49 [1] : vector<8x8xf32> to vector<8xf32>
    %70 = vector.shape_cast %69 : vector<8xf32> to vector<8x1xf32>
    %71 = tpu.reciprocal %70 {approx = true} : vector<8x1xf32> -> vector<8x1xf32>
    %72 = vector.broadcast %71 : vector<8x1xf32> to vector<8x8xf32>
    %73 = arith.mulf %68, %72 : vector<8x8xf32>
    %74 = arith.truncf %73 : vector<8x8xf32> to vector<8x8xbf16>
    %cst_50 = arith.constant dense<0.000000e+00> : vector<8x8xf32>
    %75 = tpu.matmul %74, %60, %cst_50 {dimension_numbers = #tpu.dot_dimension_numbers<[1], [0], [0], [1], [0, 0, 1, 1], [], []>} : vector<8x8xbf16>, vector<8x8xbf16>, vector<8x8xf32> -> vector<8x8xf32>
    %76 = arith.truncf %75 : vector<8x8xf32> to vector<8x8xbf16>
    %c0_51 = arith.constant 0 : index
    %c0_52 = arith.constant 0 : index
    %c16_53 = arith.constant 16 : index
    %77 = vector.load %arg3[%c0_51, %c0_52, %c16_53] : memref<1x8x32xbf16, #tpu.memory_space<vmem>>, vector<1x8x8xbf16>
    %78 = vector.shape_cast %77 : vector<1x8x8xbf16> to vector<8x8xbf16>
    %79 = vector.shape_cast %76 : vector<8x8xbf16> to vector<1x8x8xbf16>
    tpu.vector_store %arg3[%c0_51, %c0_52, %c16_53], %79 {strides = array<i32>} : memref<1x8x32xbf16, #tpu.memory_space<vmem>>, vector<1x8x8xbf16>,
    %c0_54 = arith.constant 0 : index
    %c0_55 = arith.constant 0 : index
    %c0_56 = arith.constant 0 : index
    %c24 = arith.constant 24 : index
    %80 = vector.load %arg2[%c0_54, %c0_55, %c0_56, %c24] : memref<3x1x8x32xbf16, #tpu.memory_space<vmem>>, vector<1x1x8x8xbf16>
    %81 = vector.shape_cast %80 : vector<1x1x8x8xbf16> to vector<8x8xbf16>
    %c1_57 = arith.constant 1 : index
    %c0_58 = arith.constant 0 : index
    %c0_59 = arith.constant 0 : index
    %c24_60 = arith.constant 24 : index
    %82 = vector.load %arg2[%c1_57, %c0_58, %c0_59, %c24_60] : memref<3x1x8x32xbf16, #tpu.memory_space<vmem>>, vector<1x1x8x8xbf16>
    %83 = vector.shape_cast %82 : vector<1x1x8x8xbf16> to vector<8x8xbf16>
    %c2_61 = arith.constant 2 : index
    %c0_62 = arith.constant 0 : index
    %c0_63 = arith.constant 0 : index
    %c24_64 = arith.constant 24 : index
    %84 = vector.load %arg2[%c2_61, %c0_62, %c0_63, %c24_64] : memref<3x1x8x32xbf16, #tpu.memory_space<vmem>>, vector<1x1x8x8xbf16>
    %85 = vector.shape_cast %84 : vector<1x1x8x8xbf16> to vector<8x8xbf16>
    %cst_65 = arith.constant dense<0.000000e+00> : vector<8x8xf32>
    %86 = tpu.matmul %81, %83, %cst_65 {dimension_numbers = #tpu.dot_dimension_numbers<[1], [1], [0], [0], [0, 0, 1, 0], [], []>} : vector<8x8xbf16>, vector<8x8xbf16>, vector<8x8xf32> -> vector<8x8xf32>
    %cst_66 = arith.constant 0xFF800000 : f32
    %87 = vector.broadcast %cst_66 : f32 to vector<8x8xf32>
    %88 = arith.select %4, %87, %86 : vector<8x8xi1>, vector<8x8xf32>
    %cst_67 = arith.constant dense<0xFF800000> : vector<8xf32>
    %89 = vector.multi_reduction <maximumf>, %88, %cst_67 [1] : vector<8x8xf32> to vector<8xf32>
    %90 = vector.shape_cast %89 : vector<8xf32> to vector<8x1xf32>
    %91 = vector.broadcast %90 : vector<8x1xf32> to vector<8x8xf32>
    %92 = arith.subf %88, %91 : vector<8x8xf32>
    %93 = math.exp %92 : vector<8x8xf32>
    %cst_68 = arith.constant dense<0.000000e+00> : vector<8xf32>
    %94 = vector.multi_reduction <add>, %93, %cst_68 [1] : vector<8x8xf32> to vector<8xf32>
    %95 = vector.shape_cast %94 : vector<8xf32> to vector<8x1xf32>
    %96 = tpu.reciprocal %95 {approx = true} : vector<8x1xf32> -> vector<8x1xf32>
    %97 = vector.broadcast %96 : vector<8x1xf32> to vector<8x8xf32>
    %98 = arith.mulf %93, %97 : vector<8x8xf32>
    %99 = arith.truncf %98 : vector<8x8xf32> to vector<8x8xbf16>
    %cst_69 = arith.constant dense<0.000000e+00> : vector<8x8xf32>
    %100 = tpu.matmul %99, %85, %cst_69 {dimension_numbers = #tpu.dot_dimension_numbers<[1], [0], [0], [1], [0, 0, 1, 1], [], []>} : vector<8x8xbf16>, vector<8x8xbf16>, vector<8x8xf32> -> vector<8x8xf32>
    %101 = arith.truncf %100 : vector<8x8xf32> to vector<8x8xbf16>
    %c0_70 = arith.constant 0 : index
    %c0_71 = arith.constant 0 : index
    %c24_72 = arith.constant 24 : index
    %102 = vector.load %arg3[%c0_70, %c0_71, %c24_72] : memref<1x8x32xbf16, #tpu.memory_space<vmem>>, vector<1x8x8xbf16>
    %103 = vector.shape_cast %102 : vector<1x8x8xbf16> to vector<8x8xbf16>
    %104 = vector.shape_cast %101 : vector<8x8xbf16> to vector<1x8x8xbf16>
    tpu.vector_store %arg3[%c0_70, %c0_71, %c24_72], %104 {strides = array<i32>} : memref<1x8x32xbf16, #tpu.memory_space<vmem>>, vector<1x8x8xbf16>,
    return
  }
  func.func @transform_0(%arg0: i32, %arg1: i32) -> (i32, i32, i32, i32) {
    %c0_i32 = arith.constant 0 : i32
    %c0_i32_0 = arith.constant 0 : i32
    %c0_i32_1 = arith.constant 0 : i32
    return %c0_i32, %arg0, %c0_i32_0, %arg1 : i32, i32, i32, i32
  }
  func.func @transform_1(%arg0: i32, %arg1: i32) -> (i32, i32, i32) {
    %c0_i32 = arith.constant 0 : i32
    %c0_i32_0 = arith.constant 0 : i32
    return %arg0, %c0_i32, %arg1 : i32, i32, i32
  }
}

module attributes {stable_mosaic.version = 11 : i64} {
  func.func @_matmul_kernel(%arg0: i32, %arg1: i32, %arg2: i32, %arg3: memref<16x32xf32, #tpu.memory_space<vmem>>, %arg4: memref<32x128xbf16, #tpu.memory_space<vmem>>, %arg5: memref<1x32xf32, #tpu.memory_space<vmem>>, %arg6: memref<1x32xf32, #tpu.memory_space<vmem>>, %arg7: memref<16x128xf32, #tpu.memory_space<vmem>>) attributes {dimension_semantics = [#tpu.dimension_semantics<parallel>, #tpu.dimension_semantics<parallel>, #tpu.dimension_semantics<arbitrary>], iteration_bounds = array<i64: 1, 1, 1>, scalar_prefetch = 0 : i64, scratch_operands = 0 : i64, tpu.core_type = #tpu.core_type<tc>, window_params = [{transform_indices = @transform_0, window_bounds = array<i64: 16, 32>}, {transform_indices = @transform_1, window_bounds = array<i64: 32, 128>}, {pipeline_mode = #tpu.pipeline_mode<synchronous>, transform_indices = @transform_2, window_bounds = array<i64: 1, 32>}, {pipeline_mode = #tpu.pipeline_mode<synchronous>, transform_indices = @transform_3, window_bounds = array<i64: 1, 32>}, {transform_indices = @transform_4, window_bounds = array<i64: 16, 128>}]} {
    %c0 = arith.constant 0 : index
    %c0_0 = arith.constant 0 : index
    %0 = vector.load %arg3[%c0, %c0_0] : memref<16x32xf32, #tpu.memory_space<vmem>>, vector<16x32xf32>
    %c0_1 = arith.constant 0 : index
    %c0_2 = arith.constant 0 : index
    %1 = vector.load %arg5[%c0_1, %c0_2] : memref<1x32xf32, #tpu.memory_space<vmem>>, vector<1x32xf32>
    %c0_3 = arith.constant 0 : index
    %c0_4 = arith.constant 0 : index
    %2 = vector.load %arg6[%c0_3, %c0_4] : memref<1x32xf32, #tpu.memory_space<vmem>>, vector<1x32xf32>
    %cst = arith.constant dense<0.000000e+00> : vector<16xf32>
    %3 = vector.multi_reduction <add>, %0, %cst [1] : vector<16x32xf32> to vector<16xf32>
    %4 = vector.shape_cast %3 : vector<16xf32> to vector<16x1xf32>
    %cst_5 = arith.constant 3.200000e+01 : f32
    %5 = vector.broadcast %cst_5 : f32 to vector<16x1xf32>
    %6 = arith.divf %4, %5 : vector<16x1xf32>
    %7 = vector.broadcast %6 : vector<16x1xf32> to vector<16x32xf32>
    %8 = arith.subf %0, %7 : vector<16x32xf32>
    %9 = arith.mulf %8, %8 : vector<16x32xf32>
    %cst_6 = arith.constant dense<0.000000e+00> : vector<16xf32>
    %10 = vector.multi_reduction <add>, %9, %cst_6 [1] : vector<16x32xf32> to vector<16xf32>
    %11 = vector.shape_cast %10 : vector<16xf32> to vector<16x1xf32>
    %cst_7 = arith.constant 3.200000e+01 : f32
    %12 = vector.broadcast %cst_7 : f32 to vector<16x1xf32>
    %13 = arith.divf %11, %12 : vector<16x1xf32>
    %14 = vector.broadcast %6 : vector<16x1xf32> to vector<16x32xf32>
    %15 = arith.subf %0, %14 : vector<16x32xf32>
    %cst_8 = arith.constant 9.99999974E-6 : f32
    %16 = vector.broadcast %cst_8 : f32 to vector<16x1xf32>
    %17 = arith.addf %13, %16 : vector<16x1xf32>
    %18 = math.rsqrt %17 : vector<16x1xf32>
    %19 = vector.broadcast %18 : vector<16x1xf32> to vector<16x32xf32>
    %20 = arith.mulf %15, %19 : vector<16x32xf32>
    %21 = vector.broadcast %1 : vector<1x32xf32> to vector<16x32xf32>
    %22 = arith.mulf %21, %20 : vector<16x32xf32>
    %23 = vector.broadcast %2 : vector<1x32xf32> to vector<16x32xf32>
    %24 = arith.addf %22, %23 : vector<16x32xf32>
    %25 = arith.truncf %24 : vector<16x32xf32> to vector<16x32xbf16>
    %c0_9 = arith.constant 0 : index
    %c0_10 = arith.constant 0 : index
    %26 = vector.load %arg4[%c0_9, %c0_10] : memref<32x128xbf16, #tpu.memory_space<vmem>>, vector<32x128xbf16>
    %cst_11 = arith.constant dense<0.000000e+00> : vector<16x128xf32>
    %27 = tpu.matmul %25, %26, %cst_11 {dimension_numbers = #tpu.dot_dimension_numbers<[1], [0], [0], [1], [0, 0, 1, 1], [], []>} : vector<16x32xbf16>, vector<32x128xbf16>, vector<16x128xf32> -> vector<16x128xf32>
    %c0_12 = arith.constant 0 : index
    %c0_13 = arith.constant 0 : index
    %28 = vector.load %arg7[%c0_12, %c0_13] : memref<16x128xf32, #tpu.memory_space<vmem>>, vector<16x128xf32>
    tpu.vector_store %arg7[%c0_12, %c0_13], %27 {strides = array<i32>} : memref<16x128xf32, #tpu.memory_space<vmem>>, vector<16x128xf32>,
    return
  }
  func.func @transform_0(%arg0: i32, %arg1: i32, %arg2: i32) -> (i32, i32) {
    %c0_i32 = arith.constant 0 : i32
    return %arg0, %arg2 : i32, i32
  }
  func.func @transform_1(%arg0: i32, %arg1: i32, %arg2: i32) -> (i32, i32) {
    %c0_i32 = arith.constant 0 : i32
    return %arg2, %arg1 : i32, i32
  }
  func.func @transform_2(%arg0: i32, %arg1: i32, %arg2: i32) -> (i32, i32) {
    %c0_i32 = arith.constant 0 : i32
    %c0_i32_0 = arith.constant 0 : i32
    %c0_i32_1 = arith.constant 0 : i32
    return %c0_i32, %c0_i32_0 : i32, i32
  }
  func.func @transform_3(%arg0: i32, %arg1: i32, %arg2: i32) -> (i32, i32) {
    %c0_i32 = arith.constant 0 : i32
    %c0_i32_0 = arith.constant 0 : i32
    %c0_i32_1 = arith.constant 0 : i32
    return %c0_i32, %c0_i32_0 : i32, i32
  }
  func.func @transform_4(%arg0: i32, %arg1: i32, %arg2: i32) -> (i32, i32) {
    %c0_i32 = arith.constant 0 : i32
    return %arg0, %arg1 : i32, i32
  }
}

module attributes {stable_mosaic.version = 11 : i64} {
  func.func @_matmul_kernel(%arg0: i32, %arg1: i32, %arg2: i32, %arg3: memref<16x32xbf16, #tpu.memory_space<vmem>>, %arg4: memref<32x32xbf16, #tpu.memory_space<vmem>>, %arg5: memref<1x32xf32, #tpu.memory_space<vmem>>, %arg6: memref<16x32xf32, #tpu.memory_space<vmem>>, %arg7: memref<16x32xf32, #tpu.memory_space<vmem>>) attributes {dimension_semantics = [#tpu.dimension_semantics<parallel>, #tpu.dimension_semantics<parallel>, #tpu.dimension_semantics<arbitrary>], iteration_bounds = array<i64: 1, 1, 1>, scalar_prefetch = 0 : i64, scratch_operands = 0 : i64, tpu.core_type = #tpu.core_type<tc>, window_params = [{transform_indices = @transform_0, window_bounds = array<i64: 16, 32>}, {transform_indices = @transform_1, window_bounds = array<i64: 32, 32>}, {transform_indices = @transform_2, window_bounds = array<i64: 1, 32>}, {transform_indices = @transform_3, window_bounds = array<i64: 16, 32>}, {transform_indices = @transform_4, window_bounds = array<i64: 16, 32>}]} {
    %c0 = arith.constant 0 : index
    %c0_0 = arith.constant 0 : index
    %0 = vector.load %arg3[%c0, %c0_0] : memref<16x32xbf16, #tpu.memory_space<vmem>>, vector<16x32xbf16>
    %c0_1 = arith.constant 0 : index
    %c0_2 = arith.constant 0 : index
    %1 = vector.load %arg4[%c0_1, %c0_2] : memref<32x32xbf16, #tpu.memory_space<vmem>>, vector<32x32xbf16>
    %cst = arith.constant dense<0.000000e+00> : vector<16x32xf32>
    %2 = tpu.matmul %0, %1, %cst {dimension_numbers = #tpu.dot_dimension_numbers<[1], [0], [0], [1], [0, 0, 1, 1], [], []>} : vector<16x32xbf16>, vector<32x32xbf16>, vector<16x32xf32> -> vector<16x32xf32>
    %c0_3 = arith.constant 0 : index
    %c0_4 = arith.constant 0 : index
    %3 = vector.load %arg5[%c0_3, %c0_4] : memref<1x32xf32, #tpu.memory_space<vmem>>, vector<1x32xf32>
    %4 = vector.broadcast %3 : vector<1x32xf32> to vector<16x32xf32>
    %5 = arith.addf %2, %4 : vector<16x32xf32>
    %c0_5 = arith.constant 0 : index
    %c0_6 = arith.constant 0 : index
    %6 = vector.load %arg6[%c0_5, %c0_6] : memref<16x32xf32, #tpu.memory_space<vmem>>, vector<16x32xf32>
    %7 = arith.addf %5, %6 : vector<16x32xf32>
    %c0_7 = arith.constant 0 : index
    %c0_8 = arith.constant 0 : index
    %8 = vector.load %arg7[%c0_7, %c0_8] : memref<16x32xf32, #tpu.memory_space<vmem>>, vector<16x32xf32>
    tpu.vector_store %arg7[%c0_7, %c0_8], %7 {strides = array<i32>} : memref<16x32xf32, #tpu.memory_space<vmem>>, vector<16x32xf32>,
    return
  }
  func.func @transform_0(%arg0: i32, %arg1: i32, %arg2: i32) -> (i32, i32) {
    %c0_i32 = arith.constant 0 : i32
    return %arg0, %arg2 : i32, i32
  }
  func.func @transform_1(%arg0: i32, %arg1: i32, %arg2: i32) -> (i32, i32) {
    %c0_i32 = arith.constant 0 : i32
    return %arg2, %arg1 : i32, i32
  }
  func.func @transform_2(%arg0: i32, %arg1: i32, %arg2: i32) -> (i32, i32) {
    %c0_i32 = arith.constant 0 : i32
    %c0_i32_0 = arith.constant 0 : i32
    return %c0_i32, %arg1 : i32, i32
  }
  func.func @transform_3(%arg0: i32, %arg1: i32, %arg2: i32) -> (i32, i32) {
    %c0_i32 = arith.constant 0 : i32
    return %arg0, %arg1 : i32, i32
  }
  func.func @transform_4(%arg0: i32, %arg1: i32, %arg2: i32) -> (i32, i32) {
    %c0_i32 = arith.constant 0 : i32
    return %arg0, %arg1 : i32, i32
  }
}

</mosaic_0001>

<bundles_post_ra>
// kernel: gpt_forward.25
= control target key start
LH: loop header
LB: loop body
LE: loop exit
PB: predicated region body
PF: predicated region fallthrough
CT: control target
= control target key end

     0   :  { %vm23_vm0 = vcmask 261120   ;;  %s262_s0 = inlined_call_operand.vmem [shape: f32[16,32], index: 0, kind: input, shape index: {}]   ;;  %s263_s1 = inlined_call_operand.vmem [shape: bf16[32,128], index: 1, kind: input, shape index: {}]   ;;  %s264_s2 = inlined_call_operand.vmem [shape: f32[1,32], index: 2, kind: input, shape index: {}]   ;;  %s265_s3 = inlined_call_operand.vmem [shape: f32[1,32], index: 3, kind: input, shape index: {}]   ;;  %s266_s4 = inlined_call_operand.hbm [shape: f32[16,128], index: 4, kind: output, shape index: {}]  }
   0x1   :  { %v19_v0 = vld [vmem:[%s262_s0] sm:$0xff]  ;;  %v20_v1 = vld [vmem:[%s262_s0 + $0x8] sm:$0xff] }
   0x2   :  { %v24_v2 = vsel %vm23_vm0, %v19_v0, 0.0 }
   0x3   :  { %25 = vadd.xlane.f32.xlu0 %v24_v2 }
   0x4   :  { %9 = vsyncpa [#allocation3], 0  ;;  %v27_v3 = vsel %vm23_vm0, %v20_v1, 0.0  ;;  %v167_v14 = vld [vmem:[%s263_s1] sm:$0xff]   ;;  %v197_v15 = vmov 0.0   ;;  %v168_v16 = vld [vmem:[%s263_s1 + $0x8] sm:$0xff]  }
   0x5   :  { %154 = vmatprep.subr.bf16.mxu0 %v197_v15  ;;  %vm198_vm1 = vmmov 0   ;;  %v146_v25 = vld [vmem:[%s264_s2] ss:$0 sm:$0xff]  ;;  %s199_s25 = smov [#allocation2]  }
   0x6   :  { %155 = vmatpush3.bf16.msra.mxu0 %v167_v14  ;;  %158 = vmatprep.mubr.msk.bf16.mxu0 %vm198_vm1, %v197_v15  ;;  %v147_v29 = vld [vmem:[%s265_s3] ss:$0 sm:$0xff]  ;;  %s135_s26 = sshll.u32 %s199_s25, 4  ;;  %s136_s26 = int_to_ptr.vmem [resolvable:$true] %s135_s26 }
   0x7   :  { %28 = vadd.xlane.f32.xlu0 %v27_v3  ;;  %156 = vmatprep.subr.bf16.mxu0 %v197_v15  ;;  %s173_s2 = scalar_lea.vmem %s136_s26, 256  ;;  %p178_p1 = scmp.lt.s32.totalorder %s136_s26, %s136_s26 }
   0x8   :  { %p174_p0 = scmp.ne.s32.totalorder %s136_s26, %s173_s2  ;;  %p179_p2 = scmp.lt.s32.totalorder %s173_s2, %s173_s2 }
   0xa   :  { %157 = vmatpush3.bf16.msra.mxu0 %v168_v16  ;;  %p180_p3 = por %p179_p2, %p178_p1 }
   0xc   :  { %p181_p4 = pnand %p180_p3, %p174_p0 }
  0x90   :  { %v26_v4 = vpop.xlane.xlu0 %25 }
  0x91   :  { %v31_v5 = vmul.f32 0.03125, %v26_v4 }
  0x93   :  { %v33_v6 = vsub.f32 %v19_v0, %v31_v5 }
  0x94   :  { %v29_v7 = vpop.xlane.xlu0 %28 }
  0x95   :  { %v32_v8 = vmul.f32 0.03125, %v29_v7  ;;  %v35_v9 = vmul.f32 %v33_v6, %v33_v6 }
  0x97   :  { %v34_v10 = vsub.f32 %v20_v1, %v32_v8  ;;  %v37_v11 = vsel %vm23_vm0, %v35_v9, 0.0 }
  0x98   :  { %38 = vadd.xlane.f32.xlu1 %v37_v11 }
  0x99   :  { %v36_v12 = vmul.f32 %v34_v10, %v34_v10 }
  0x9b   :  { %v40_v13 = vsel %vm23_vm0, %v36_v12, 0.0 }
  0x9c   :  { %41 = vadd.xlane.f32.xlu1 %v40_v13 }
 0x125   :  { %v39_v17 = vpop.xlane.xlu1 %38 }
 0x126   :  { %v43_v18 = vmul.f32 0.03125, %v39_v17 }
 0x128   :  { %v45_v19 = vadd.f32 1e-05, %v43_v18 }
 0x129   :  { %v42_v20 = vpop.xlane.xlu1 %41 }
 0x12a   :  { %169 = vrsqrt.f32 %v45_v19  ;;  %v44_v21 = vmul.f32 0.03125, %v42_v20 }
 0x12c   :  { %v46_v22 = vadd.f32 1e-05, %v44_v21 }
 0x12e   :  { %171 = vrsqrt.f32 %v46_v22 }
 0x134   :  { %v170_v23 = vpop.eup %169 }
 0x135   :  { %v49_v24 = vmul.f32 %v170_v23, %v33_v6 }
 0x137   :  { %v57_v28 = vmul.f32 %v146_v25, %v49_v24 }
 0x138   :  { %v172_v26 = vpop.eup %171 }
 0x139   :  { %v50_v27 = vmul.f32 %v172_v26, %v34_v10  ;;  %v65_v31 = vadd.f32 %v147_v29, %v57_v28 }
 0x13b   :  { %v58_v30 = vmul.f32 %v146_v25, %v50_v27 }
 0x13d   :  { %v66_v32 = vadd.f32 %v147_v29, %v58_v30 }
 0x13f   :  { %v67_v33 = vpack.c.bf16 %v66_v32, %v65_v31 }
 0x141   :  { %159 = vmatmul.mubr.msk.bf16.vlgmr.msra.gmra.mrb[0].mxu0 %vm23_vm0, %v67_v33 }
 0x214   :  { %v121_v34 = vpop.f32.mrb[0].mxu0 }
 0x215   :  { %128 = vst [vmem:[#allocation2] sm:$0xff] %v121_v34  ;;  %v160_v35 = vpop.f32.mrb[1].mxu0 }
 0x216   :  { %v124_v36 = vpop.f32.mrb[2].mxu0 }
 0x217   :  { %129 = vst [vmem:[#allocation2 + $0x8] sm:$0xff] %v124_v36  ;;  %v161_v37 = vpop.f32.mrb[3].mxu0 }
 0x218   :  { %184 = shalt.err (!%p181_p4)
}
 0x219   :  { %s185_s28 = scalar_lea.hbm %s266_s4, 256 }
 0x21a   :  { %p186_p5 = scmp.ne.s32.totalorder %s266_s4, %s185_s28  ;;  %p189_p6 = scmp.lt.u32.totalorder %s185_s28, %s266_s4 }
 0x21c   :  { %p191_p7 = pnand %p189_p6, %p186_p5 }
 0x21e   :  { %194 = shalt.err (!%p191_p7)
}
 0x21f   :  { %s200_s7 = smov 128   ;;  %s201_s8 = smov 8  }
 0x220   :  { %141 = dma.vmem_to_hbm [thread:$0]  %s136_s26, 256, %s266_s4, [#allocation3], %s200_s7, %s200_s7, %s201_s8  }
 0x221   :  { %195 = dma.done.wait [#allocation3], 256  }
 0x222   :  { %196 = vsyncadd [#allocation3], 4294967040 }
 0x223   :  { %145 = vsyncpa [#allocation3], 1 }

// kernel: gpt_forward.15
= control target key start
LH: loop header
LB: loop body
LE: loop exit
PB: predicated region body
PF: predicated region fallthrough
CT: control target
= control target key end

     0   :  { %v124_v0 = vmov 0.0   ;;  %vm125_vm0 = vmmov 0   ;;  %vm48_vm1 = vcmask 261120   ;;  %s178_s1 = inlined_call_operand.vmem [shape: bf16[32,32], index: 1, kind: input, shape index: {}]   ;;  %s179_s0 = inlined_call_operand.vmem [shape: bf16[16,32], index: 0, kind: input, shape index: {}]   ;;  %s180_s2 = inlined_call_operand.vmem [shape: f32[1,32], index: 2, kind: input, shape index: {}]   ;;  %s181_s3 = inlined_call_operand.vmem [shape: f32[16,32], index: 3, kind: input, shape index: {}]   ;;  %s182_s4 = inlined_call_operand.vmem [shape: f32[16,32], index: 4, kind: output, shape index: {}]  }
   0x1   :  { %111 = vmatprep.subr.bf16.mxu0 %v124_v0  ;;  %v121_v1 = vld [vmem:[%s178_s1] sm:$0xff]   ;;  %115 = vmatprep.mubr.msk.bf16.mxu0 %vm125_vm0, %v124_v0  ;;  %v122_v2 = vld [vmem:[%s178_s1 + $0x8] sm:$0xff]  }
   0x2   :  { %112 = vmatpush3.bf16.msra.mxu0 %v121_v1  ;;  %v123_v3 = vld [vmem:[%s179_s0] sm:$0xff]   ;;  %v94_v10 = vld [vmem:[%s181_s3 + $0x8] sm:$0xff] }
   0x3   :  { %113 = vmatprep.subr.bf16.mxu0 %v124_v0  ;;  %v103_v4 = vld [vmem:[%s180_s2] ss:$0 sm:$0xff] }
   0x4   :  { %v93_v6 = vld [vmem:[%s181_s3] sm:$0xff] }
   0x6   :  { %114 = vmatpush3.bf16.msra.mxu0 %v122_v2 }
   0x9   :  { %116 = vmatmul.mubr.msk.bf16.vlgmr.msra.gmra.mrb[0].mxu0 %vm48_vm1, %v123_v3 }
  0xdc   :  { %v86_v5 = vpop.f32.mrb[0].mxu0 }
  0xdd   :  { %v87_v7 = vadd.f32 %v103_v4, %v86_v5  ;;  %v117_v8 = vpop.f32.mrb[1].mxu0 }
  0xde   :  { %v89_v9 = vpop.f32.mrb[2].mxu0 }
  0xdf   :  { %v95_v11 = vadd.f32 %v93_v6, %v87_v7  ;;  %v90_v12 = vadd.f32 %v103_v4, %v89_v9  ;;  %v118_v13 = vpop.f32.mrb[3].mxu0 }
  0xe1   :  { %97 = vst.msk [vmem:[%s182_s4] sm:$0xff] %vm48_vm1, %v95_v11  ;;  %v96_v14 = vadd.f32 %v94_v10, %v90_v12 }
  0xe3   :  { %98 = vst.msk [vmem:[%s182_s4 + $0x8] sm:$0xff] %vm48_vm1, %v96_v14 }

// kernel: gpt_forward.13
= control target key start
LH: loop header
LB: loop body
LE: loop exit
PB: predicated region body
PF: predicated region fallthrough
CT: control target
= control target key end

     0   :  { %vm22_vm0 = vcmask 261120   ;;  %v170_v15 = vmov 0.0   ;;  %vm171_vm1 = vmmov 0   ;;  %vm135_vm2 = vcmask 781312   ;;  %s226_s0 = inlined_call_operand.vmem [shape: f32[16,32], index: 0, kind: input, shape index: {}]   ;;  %s227_s1 = inlined_call_operand.vmem [shape: bf16[32,96], index: 1, kind: input, shape index: {}]   ;;  %s228_s2 = inlined_call_operand.vmem [shape: f32[1,32], index: 2, kind: input, shape index: {}]   ;;  %s229_s3 = inlined_call_operand.vmem [shape: f32[1,32], index: 3, kind: input, shape index: {}]   ;;  %s230_s4 = inlined_call_operand.vmem [shape: bf16[16,96], index: 4, kind: output, shape index: {}]  }
   0x1   :  { %v18_v0 = vld [vmem:[%s226_s0] sm:$0xff]  ;;  %v19_v1 = vld [vmem:[%s226_s0 + $0x8] sm:$0xff]  ;;  %154 = vmatprep.subr.bf16.mxu0 %v170_v15  ;;  %158 = vmatprep.mubr.msk.bf16.mxu0 %vm171_vm1, %v170_v15 }
   0x2   :  { %v23_v2 = vsel %vm22_vm0, %v18_v0, 0.0  ;;  %v26_v3 = vsel %vm22_vm0, %v19_v1, 0.0  ;;  %v164_v14 = vld [vmem:[%s227_s1] sm:$0xff]   ;;  %v165_v16 = vld [vmem:[%s227_s1 + $0x8] sm:$0xff]  }
   0x3   :  { %24 = vadd.xlane.f32.xlu0 %v23_v2  ;;  %155 = vmatpush3.bf16.msra.mxu0 %v164_v14  ;;  %v142_v25 = vld [vmem:[%s228_s2] ss:$0 sm:$0xff] }
   0x4   :  { %156 = vmatprep.subr.bf16.mxu0 %v170_v15  ;;  %v143_v29 = vld [vmem:[%s229_s3] ss:$0 sm:$0xff] }
   0x7   :  { %27 = vadd.xlane.f32.xlu0 %v26_v3  ;;  %157 = vmatpush3.bf16.msra.mxu0 %v165_v16 }
  0x90   :  { %v25_v4 = vpop.xlane.xlu0 %24 }
  0x91   :  { %v30_v5 = vmul.f32 0.03125, %v25_v4 }
  0x93   :  { %v32_v6 = vsub.f32 %v18_v0, %v30_v5 }
  0x94   :  { %v28_v7 = vpop.xlane.xlu0 %27 }
  0x95   :  { %v31_v8 = vmul.f32 0.03125, %v28_v7  ;;  %v34_v9 = vmul.f32 %v32_v6, %v32_v6 }
  0x97   :  { %v33_v10 = vsub.f32 %v19_v1, %v31_v8  ;;  %v36_v11 = vsel %vm22_vm0, %v34_v9, 0.0 }
  0x98   :  { %37 = vadd.xlane.f32.xlu1 %v36_v11 }
  0x99   :  { %v35_v12 = vmul.f32 %v33_v10, %v33_v10 }
  0x9b   :  { %v39_v13 = vsel %vm22_vm0, %v35_v12, 0.0 }
  0x9c   :  { %40 = vadd.xlane.f32.xlu1 %v39_v13 }
 0x125   :  { %v38_v17 = vpop.xlane.xlu1 %37 }
 0x126   :  { %v42_v18 = vmul.f32 0.03125, %v38_v17 }
 0x128   :  { %v44_v19 = vadd.f32 1e-05, %v42_v18 }
 0x129   :  { %v41_v20 = vpop.xlane.xlu1 %40 }
 0x12a   :  { %166 = vrsqrt.f32 %v44_v19  ;;  %v43_v21 = vmul.f32 0.03125, %v41_v20 }
 0x12c   :  { %v45_v22 = vadd.f32 1e-05, %v43_v21 }
 0x12e   :  { %168 = vrsqrt.f32 %v45_v22 }
 0x134   :  { %v167_v23 = vpop.eup %166 }
 0x135   :  { %v48_v24 = vmul.f32 %v167_v23, %v32_v6 }
 0x137   :  { %v56_v28 = vmul.f32 %v142_v25, %v48_v24 }
 0x138   :  { %v169_v26 = vpop.eup %168 }
 0x139   :  { %v49_v27 = vmul.f32 %v169_v26, %v33_v10  ;;  %v64_v31 = vadd.f32 %v143_v29, %v56_v28 }
 0x13b   :  { %v57_v30 = vmul.f32 %v142_v25, %v49_v27 }
 0x13d   :  { %v65_v32 = vadd.f32 %v143_v29, %v57_v30 }
 0x13f   :  { %v66_v33 = vpack.c.bf16 %v65_v32, %v64_v31 }
 0x141   :  { %159 = vmatmul.mubr.msk.bf16.vlgmr.msra.gmra.mrb[0].mxu0 %vm22_vm0, %v66_v33 }
 0x214   :  { %v120_v34 = vpop.f32.mrb[0].mxu0 }
 0x215   :  { %v149_v35 = vpack.c.bf16 %v120_v34, %v120_v34  ;;  %v160_v36 = vpop.f32.mrb[1].mxu0 }
 0x216   :  { %v123_v37 = vpop.f32.mrb[2].mxu0 }
 0x217   :  { %136 = vst.msk [vmem:[%s230_s4] sm:$0xf] %vm135_vm2, %v149_v35  ;;  %v150_v38 = vpack.c.bf16 %v123_v37, %v123_v37  ;;  %v161_v39 = vpop.f32.mrb[3].mxu0 }
 0x219   :  { %137 = vst.msk [vmem:[%s230_s4 + $0x4] sm:$0xf] %vm135_vm2, %v150_v38 }

// kernel: gpt_forward.14
= control target key start
LH: loop header
LB: loop body
LE: loop exit
PB: predicated region body
PF: predicated region fallthrough
CT: control target
= control target key end

     0   :  { %s1019_s6 = smov 0   ;;  %s1021_s7 = smov 0   ;;  %s1180_s0 = inlined_call_operand.vmem [shape: bf16[3,2,8,32], index: 0, kind: input, shape index: {}]   ;;  %s1181_s1 = inlined_call_operand.vmem [shape: bf16[2,8,32], index: 1, kind: output, shape index: {}]  }
   0x1   :  { %s1023_s8 = smov 0   ;;  %s1025_s9 = smov 0  }
   0x2   :  { %s1027_s10 = smov 0  }
   0x3 LB: > { %s23_s11 = sadd.s32 1, %s995_s9  ;;  %p39_p1 = scmp.ne.s32.totalorder %s987_s7, %s983_s6  ;;  %s999_s10 = sphi %s1027_s10, %s11_s10   ;;  %s995_s9 = sphi %s1025_s9, %s1185_s9   ;;  %s991_s8 = sphi %s1023_s8, %s1184_s8   ;;  %s987_s7 = sphi %s1021_s7, %s1183_s7   ;;  %s983_s6 = sphi %s1019_s6, %s1182_s6  }
   0x4   : > { %p25_p0 = scmp.ge.s32.totalorder %s23_s11, 2  ;;  %p40_p2 = scmp.eq.s32.totalorder %s999_s10, 0 }
   0x5   : > { %s32_s13 = sadd.s32 1, %s987_s7  ;;  %p785_p5 = scmp.ge.s32.totalorder %s999_s10, 2 }
   0x6   : > { %s1187_s11 = smov (%p25_p0, %s23_s11), 0  ;;  %p41_p3 = por %p40_p2, %p39_p1 }
   0x7   : > { %s27_s12 = ssub.s32 %s995_s9, %s1187_s11  ;;  %93 = sbr.rel (%p785_p5) target bundleno = 21 (0x15), region = 16 }
   0x8   : > { %p30_p4 = scmp.eq.s32.totalorder %s27_s12, 0 }
   0xa   : > { %s1054_s14 = scalar_select %p30_p4, %s987_s7, %s32_s13  }
   0xe   : > { %96 = sbr.rel (!%p41_p3) target bundleno = 21 (0x15), region = 20  ;;  %s98_s15 = sand.u32 (%p41_p3), 1, %s987_s7  }
   0xf   : > { %s786_s16 = sshll.u32 (%p41_p3), %s995_s9, 2  ;;  %s886_s17 = smul.u32 (%p41_p3), 12, %s98_s15 }
  0x10   : > { %s103_s20 = scalar_lea.vmem (%p41_p3), %s1180_s0, %s786_s16 }
  0x11   : > { %v119_v0 = vld [vmem:[%s103_s20] sm:$0xf] (%p41_p3)  ;;  %v121_v1 = vld [vmem:[%s103_s20 + $0x8] sm:$0xf] (%p41_p3)  ;;  %v123_v2 = vld [vmem:[%s103_s20 + $0x10] sm:$0xf] (%p41_p3) }
  0x12   : > { %s100_s21 = scalar_lea.vmem (%p41_p3), [#allocation2], %s886_s17 }
  0x13   : > { %120 = vst [vmem:[%s100_s21] sm:$0xf] (%p41_p3), %v119_v0  ;;  %122 = vst [vmem:[%s100_s21 + $0x4] sm:$0xf] (%p41_p3), %v121_v1 }
  0x14   : > { %124 = vst [vmem:[%s100_s21 + $0x8] sm:$0xf] (%p41_p3), %v123_v2 }
  0x15 PF: > { %p787_p6 = scmp.ge.s32.totalorder %s999_s10, 1  ;;  %p152_p7 = scmp.lt.s32.totalorder %s999_s10, 3 }
  0x17   : > { %p153_p8 = pnand %p787_p6, %p152_p7 }
  0x18   : > { %s159_s22 = sand.u32 (!%p153_p8), 1, %s983_s6   ;;  %v1001_v3 = vmov (!%p153_p8), 0.0   ;;  %vm1002_vm0 = vmmov (!%p153_p8), 0   ;;  %vm198_vm1 = vcmask (!%p153_p8), 64512   ;;  %v188_v7 = vlaneseq (!%p153_p8)  ;;  %s1003_s25 = smov (!%p153_p8), 120  }
  0x19   : > { %156 = sbr.rel (%p153_p8) target bundleno = 1487 (0x5cf), region = 61  ;;  %838 = vmatprep.subr.bf16.mxu0 (!%p153_p8), %v1001_v3  ;;  %840 = vmatprep.mubr.msk.bf16.mxu0 (!%p153_p8), %vm1002_vm0, %v1001_v3  ;;  %s1004_s26 = smov (!%p153_p8), 112   ;;  %vm261_vm3 = vcmask (!%p153_p8), 1043456   ;;  %vm306_vm4 = vcmask (!%p153_p8), 60416   ;;  %vm438_vm5 = vcmask (!%p153_p8), 126016   ;;  %vm570_vm6 = vcmask (!%p153_p8), 191616  }
  0x1a   : > { %s887_s23 = smul.u32 (!%p153_p8), 12, %s159_s22  ;;  %844 = vmatprep.subr.bf16.mxu1 (!%p153_p8), %v1001_v3  ;;  %846 = vmatprep.mubr.msk.bf16.mxu1 (!%p153_p8), %vm1002_vm0, %v1001_v3  ;;  %v1080_v8 = vshrl.u32 (!%p153_p8), %v188_v7, 7  ;;  %v1082_v9 = vand.u32 (!%p153_p8), 127, %v188_v7  ;;  %s1005_s27 = smov (!%p153_p8), 104   ;;  %vm702_vm7 = vcmask (!%p153_p8), 257216  }
  0x1b   : > { %p180_p9 = scmp.lt.s32.totalorder (!%p153_p8), %s991_s8, 1  ;;  %s1006_s3 = smov (!%p153_p8), 8  }
  0x1c   : > { %s1071_s24 = scalar_lea.vmem (!%p153_p8), [#allocation2], %s887_s23  ;;  %vm192_vm2 = vcmp.gt.s32.totalorder (!%p153_p8), %v1082_v9, %v1080_v8  ;;  %s1007_s4 = smov (!%p153_p8), 16  }
  0x1d   : > { %v789_v4 = vld [vmem:[%s1071_s24 + $0x4] sm:$0xf] (!%p153_p8)  ;;  %v193_v6 = vld [vmem:[%s1071_s24] sm:$0xf] (!%p153_p8)  ;;  %v790_v26 = vld [vmem:[%s1071_s24 + $0x8] sm:$0xf] (!%p153_p8) }
  0x1e   : > { %v203_v5 = vsel (!%p153_p8), %vm198_vm1, %v789_v4, 0  ;;  %v936_v16 = vld [vmem:[%s1071_s24 + $0x4] ss:$0 sps:$4 sm:$0xff] (!%p153_p8)   ;;  %v937_v17 = vld [vmem:[%s1071_s24] ss:$0 sps:$4 sm:$0xff] (!%p153_p8)   ;;  %v263_v27 = vsel (!%p153_p8), %vm261_vm3, %v790_v26, 0 }
  0x1f   : > { %839 = vmatpush3.bf16.xpose.msra.mxu0 (!%p153_p8), %v203_v5  ;;  %319 = vrot.lane.b32.xlu1 (!%p153_p8), %v936_v16, %s1003_s25  ;;  %v939_v18 = vld [vmem:[%s1071_s24] ss:$0 sps:$4 sm:$0xff] (!%p153_p8)   ;;  %v940_v19 = vld [vmem:[%s1071_s24 + $0x4] ss:$0 sps:$4 sm:$0xff] (!%p153_p8)   ;;  %s1008_s5 = smov (!%p153_p8), 24  }
  0x20   : > { %856 = vmatprep.subr.bf16.mxu0 %v1001_v3  ;;  %v941_v20 = vld [vmem:[%s1071_s24] ss:$0 sps:$4 sm:$0xff]   ;;  %845 = vmatpush3.bf16.msra.mxu1 %v263_v27  ;;  %v938_v28 = vld [vmem:[%s1071_s24 + $0x4] ss:$0 sps:$4 sm:$0xff]   ;;  %s1189_s8 = smov (!%p180_p9, %s991_s8), 1 }
  0x21   : > { %850 = vmatprep.subr.bf16.mxu1 %v1001_v3  ;;  %s788_s28 = sshll.u32 %s1189_s8, 2 }
  0x22   : > { %s1126_s2 = scalar_lea.vmem %s1181_s1, %s788_s28 }
  0x23   : > { %314 = vrot.lane.b32.xlu1 %v937_v17, %s1003_s25 }
  0x26   : > { %841 = vmatmul.mubr.msk.bf16.vlgmr.msra.gmra.mrb[0].mxu0 %vm198_vm1, %v193_v6 }
  0x27   : > { %858 = vmatprep.mubr.msk.bf16.mxu0 %vm1002_vm0, %v1001_v3  ;;  %446 = vrot.lane.b32.xlu1 %v939_v18, %s1004_s26 }
  0x2b   : > { %583 = vrot.lane.b32.xlu1 %v940_v19, %s1005_s27  ;;  %v944_v19 = vld [vmem:[%s1071_s24 + $0x8] ss:$0 sps:$4 sm:$0xff]  }
  0x2f   : > { %578 = vrot.lane.b32.xlu1 %v941_v20, %s1005_s27 }
  0x91   : > { %v320_v31 = vpop.permute.xlu1 %319 }
  0x92   : > { %v325_v33 = vsel %vm198_vm1, %v320_v31, 0 }
  0x95   : > { %v315_v35 = vpop.permute.xlu1 %314 }
  0x99   : > { %v447_v37 = vpop.permute.xlu1 %446 }
  0x9d   : > { %v584_v39 = vpop.permute.xlu1 %583 }
  0x9e   : > { %v589_v40 = vsel %vm198_vm1, %v584_v39, 0 }
  0xa1   : > { %v579_v41 = vpop.permute.xlu1 %578 }
  0xf9   : > { %v239_v10 = vpop.f32.mrb[0].mxu0 }
  0xfa   : > { %v245_v11 = vsel %vm192_vm2, -inf, %v239_v10  ;;  %v842_v12 = vpop.f32.mrb[1].mxu0 }
  0xfb   : > { %v242_v13 = vpop.f32.mrb[2].mxu0  ;;  %v246_v14 = vsel %vm198_vm1, %v245_v11, -inf  ;;  %v942_v12 = vld [vmem:[%s1071_s24 + $0x8] ss:$0 sps:$4 sm:$0xff]  }
  0xfc   : > { %247 = vmax.xlane.f32.xlu0 %v246_v14  ;;  %v843_v15 = vpop.f32.mrb[3].mxu0  ;;  %v943_v13 = vld [vmem:[%s1071_s24 + $0x8] ss:$0 sps:$4 sm:$0xff]  }
 0x189   : > { %v248_v21 = vpop.xlane.xlu0 %247 }
 0x18a   : > { %v249_v22 = vsub.f32 %v245_v11, %v248_v21 }
 0x18c   : > { %v250_v23 = vmul.f32 1.442695, %v249_v22 }
 0x18e   : > { %945 = vpow2.f32 %v250_v23 }
 0x198   : > { %v946_v24 = vpop.eup %945 }
 0x199   : > { %v252_v25 = vsel %vm198_vm1, %v946_v24, 0.0 }
 0x19a   : > { %253 = vadd.xlane.f32.xlu0 %v252_v25 }
 0x1b0   : > { %451 = vrot.lane.b32.xlu0 %v938_v28, %s1004_s26 }
 0x227   : > { %v254_v29 = vpop.xlane.xlu0 %253 }
 0x228   : > { %947 = vrcp.f32 %v254_v29 }
 0x22b   : > { %v452_v36 = vpop.permute.xlu0 %451 }
 0x22c   : > { %v457_v38 = vsel %vm198_vm1, %v452_v36, 0 }
 0x232   : > { %v948_v30 = vpop.eup %947 }
 0x233   : > { %v256_v32 = vmul.f32 %v948_v30, %v946_v24 }
 0x235   : > { %v257_v34 = vpack.c.bf16 %v256_v32, %v256_v32 }
 0x237   : > { %847 = vmatmul.mubr.msk.bf16.vlgmr.msra.gmra.mrb[0].mxu1 %vm198_vm1, %v257_v34 }
 0x238   : > { %851 = vmatpush3.bf16.xpose.msra.mxu1 %v325_v33  ;;  %852 = vmatprep.mubr.msk.bf16.mxu1 %vm1002_vm0, %v1001_v3 }
 0x239   : > { %862 = vmatprep.subr.bf16.mxu1 %v1001_v3 }
 0x23f   : > { %853 = vmatmul.mubr.msk.bf16.vlgmr.msra.gmra.mrb[4].mxu1 %vm198_vm1, %v315_v35 }
 0x240   : > { %863 = vmatpush3.bf16.xpose.msra.mxu1 %v457_v38  ;;  %864 = vmatprep.mubr.msk.bf16.mxu1 %vm1002_vm0, %v1001_v3 }
 0x241   : > { %874 = vmatprep.subr.bf16.mxu1 %v1001_v3 }
 0x247   : > { %865 = vmatmul.mubr.msk.bf16.vlgmr.msra.gmra.mrb[8].mxu1 %vm198_vm1, %v447_v37 }
 0x248   : > { %875 = vmatpush3.bf16.xpose.msra.mxu1 %v589_v40  ;;  %876 = vmatprep.mubr.msk.bf16.mxu1 %vm1002_vm0, %v1001_v3 }
 0x24f   : > { %877 = vmatmul.mubr.msk.bf16.vlgmr.msra.gmra.mrb[12].mxu1 %vm198_vm1, %v579_v41 }
 0x30a   : > { %v299_v42 = vpop.f32.mrb[0].mxu1 }
 0x30b   : > { %v305_v43 = vpack.c.bf16 %v299_v42, %v299_v42  ;;  %v848_v44 = vpop.f32.mrb[1].mxu1 }
 0x30c   : > { %v302_v45 = vpop.f32.mrb[2].mxu1 }
 0x30d   : > { %307 = vst.msk [vmem:[%s1126_s2] sm:$0xf] %vm306_vm4, %v305_v43  ;;  %v849_v46 = vpop.f32.mrb[3].mxu1 }
 0x312   : > { %v361_v47 = vpop.f32.mrb[4].mxu1 }
 0x313   : > { %v367_v48 = vsel %vm192_vm2, -inf, %v361_v47  ;;  %v854_v49 = vpop.f32.mrb[5].mxu1 }
 0x314   : > { %v364_v50 = vpop.f32.mrb[6].mxu1  ;;  %v368_v51 = vsel %vm198_vm1, %v367_v48, -inf }
 0x315   : > { %369 = vmax.xlane.f32.xlu1 %v368_v51  ;;  %v855_v52 = vpop.f32.mrb[7].mxu1 }
 0x31a   : > { %v493_v53 = vpop.f32.mrb[8].mxu1 }
 0x31b   : > { %v499_v54 = vsel %vm192_vm2, -inf, %v493_v53  ;;  %v866_v55 = vpop.f32.mrb[9].mxu1 }
 0x31c   : > { %v500_v56 = vsel %vm198_vm1, %v499_v54, -inf  ;;  %v496_v57 = vpop.f32.mrb[10].mxu1 }
 0x31d   : > { %501 = vmax.xlane.f32.xlu0 %v500_v56  ;;  %v867_v58 = vpop.f32.mrb[11].mxu1 }
 0x322   : > { %v625_v59 = vpop.f32.mrb[12].mxu1 }
 0x323   : > { %v631_v60 = vsel %vm192_vm2, -inf, %v625_v59  ;;  %v878_v61 = vpop.f32.mrb[13].mxu1 }
 0x324   : > { %v632_v62 = vsel %vm198_vm1, %v631_v60, -inf  ;;  %v628_v63 = vpop.f32.mrb[14].mxu1 }
 0x325   : > { %633 = vmax.xlane.f32.xlu1 %v632_v62  ;;  %v879_v0 = vpop.f32.mrb[15].mxu1 }
 0x3a2   : > { %v370_v1 = vpop.xlane.xlu1 %369 }
 0x3a3   : > { %v371_v2 = vsub.f32 %v367_v48, %v370_v1 }
 0x3a5   : > { %v372_v4 = vmul.f32 1.442695, %v371_v2 }
 0x3a7   : > { %949 = vpow2.f32 %v372_v4 }
 0x3aa   : > { %v502_v5 = vpop.xlane.xlu0 %501 }
 0x3ab   : > { %v503_v6 = vsub.f32 %v499_v54, %v502_v5 }
 0x3ad   : > { %v504_v7 = vmul.f32 1.442695, %v503_v6 }
 0x3af   : > { %951 = vpow2.f32 %v504_v7 }
 0x3b1   : > { %v950_v10 = vpop.eup %949 }
 0x3b2   : > { %v374_v8 = vsel %vm198_vm1, %v950_v10, 0.0  ;;  %v634_v14 = vpop.xlane.xlu1 %633 }
 0x3b3   : > { %375 = vadd.xlane.f32.xlu1 %v374_v8  ;;  %v635_v15 = vsub.f32 %v631_v60, %v634_v14 }
 0x3b5   : > { %v636_v16 = vmul.f32 1.442695, %v635_v15 }
 0x3b7   : > { %953 = vpow2.f32 %v636_v16 }
 0x3b9   : > { %v952_v9 = vpop.eup %951 }
 0x3ba   : > { %v506_v11 = vsel %vm198_vm1, %v952_v9, 0.0 }
 0x3bb   : > { %507 = vadd.xlane.f32.xlu0 %v506_v11 }
 0x3c1   : > { %v954_v17 = vpop.eup %953 }
 0x3c2   : > { %v638_v18 = vsel %vm198_vm1, %v954_v17, 0.0 }
 0x3c4   : > { %515 = vrot.lane.b32.xlu1 %v942_v12, %s1004_s26 }
 0x3d1   : > { %383 = vrot.lane.b32.xlu0 %v943_v13, %s1003_s25 }
 0x3e8   : > { %639 = vadd.xlane.f32.xlu1 %v638_v18 }
 0x3f9   : > { %647 = vrot.lane.b32.xlu1 %v944_v19, %s1005_s27 }
 0x440   : > { %v376_v20 = vpop.xlane.xlu1 %375 }
 0x441   : > { %955 = vrcp.f32 %v376_v20 }
 0x444   : > { %v516_v26 = vpop.permute.xlu1 %515 }
 0x445   : > { %v521_v28 = vsel %vm261_vm3, %v516_v26, 0 }
 0x448   : > { %v508_v21 = vpop.xlane.xlu0 %507 }
 0x449   : > { %957 = vrcp.f32 %v508_v21 }
 0x44b   : > { %v956_v22 = vpop.eup %955 }
 0x44c   : > { %v378_v23 = vmul.f32 %v956_v22, %v950_v10  ;;  %v384_v24 = vpop.permute.xlu0 %383 }
 0x44d   : > { %v389_v25 = vsel %vm261_vm3, %v384_v24, 0 }
 0x44e   : > { %857 = vmatpush3.bf16.msra.mxu0 %v389_v25  ;;  %v379_v27 = vpack.c.bf16 %v378_v23, %v378_v23 }
 0x44f   : > { %868 = vmatprep.subr.bf16.mxu0 %v1001_v3 }
 0x451   : > { %859 = vmatmul.mubr.msk.bf16.vlgmr.msra.gmra.mrb[4].mxu0 %vm198_vm1, %v379_v27 }
 0x452   : > { %869 = vmatpush3.bf16.msra.mxu0 %v521_v28  ;;  %870 = vmatprep.mubr.msk.bf16.mxu0 %vm1002_vm0, %v1001_v3 }
 0x453   : > { %v958_v29 = vpop.eup %957  ;;  %880 = vmatprep.subr.bf16.mxu0 %v1001_v3 }
 0x454   : > { %v510_v30 = vmul.f32 %v958_v29, %v952_v9 }
 0x456   : > { %v511_v31 = vpack.c.bf16 %v510_v30, %v510_v30 }
 0x459   : > { %871 = vmatmul.mubr.msk.bf16.vlgmr.msra.gmra.mrb[8].mxu0 %vm198_vm1, %v511_v31 }
 0x45a   : > { %882 = vmatprep.mubr.msk.bf16.mxu0 %vm1002_vm0, %v1001_v3 }
 0x475   : > { %v640_v32 = vpop.xlane.xlu1 %639 }
 0x476   : > { %959 = vrcp.f32 %v640_v32 }
 0x479   : > { %v648_v33 = vpop.permute.xlu1 %647 }
 0x47a   : > { %v653_v34 = vsel %vm261_vm3, %v648_v33, 0 }
 0x47b   : > { %881 = vmatpush3.bf16.msra.mxu0 %v653_v34 }
 0x480   : > { %v960_v35 = vpop.eup %959 }
 0x481   : > { %v642_v36 = vmul.f32 %v960_v35, %v954_v17 }
 0x483   : > { %v643_v37 = vpack.c.bf16 %v642_v36, %v642_v36 }
 0x485   : > { %883 = vmatmul.mubr.msk.bf16.vlgmr.msra.gmra.mrb[12].mxu0 %vm198_vm1, %v643_v37 }
 0x524   : > { %v425_v38 = vpop.f32.mrb[4].mxu0 }
 0x525   : > { %v819_v39 = vpack.c.bf16 %v425_v38, %v425_v38  ;;  %v860_v40 = vpop.f32.mrb[5].mxu0 }
 0x526   : > { %v428_v41 = vpop.f32.mrb[6].mxu0 }
 0x527   : > { %435 = vrot.lane.b32.xlu0 %v819_v39, %s1006_s3  ;;  %v861_v42 = vpop.f32.mrb[7].mxu0 }
 0x52c   : > { %v557_v43 = vpop.f32.mrb[8].mxu0 }
 0x52d   : > { %v820_v3 = vpack.c.bf16 %v557_v43, %v557_v43  ;;  %v872_v44 = vpop.f32.mrb[9].mxu0 }
 0x52e   : > { %v560_v45 = vpop.f32.mrb[10].mxu0 }
 0x52f   : > { %567 = vrot.lane.b32.xlu1 %v820_v3, %s1007_s4  ;;  %v873_v46 = vpop.f32.mrb[11].mxu0 }
 0x558   : > { %v689_v47 = vpop.f32.mrb[12].mxu0 }
 0x559   : > { %v821_v48 = vpack.c.bf16 %v689_v47, %v689_v47  ;;  %v884_v49 = vpop.f32.mrb[13].mxu0 }
 0x55a   : > { %v692_v50 = vpop.f32.mrb[14].mxu0 }
 0x55b   : > { %699 = vrot.lane.b32.xlu0 %v821_v48, %s1008_s5  ;;  %v885_v51 = vpop.f32.mrb[15].mxu0 }
 0x599   : > { %v436_v52 = vpop.permute.xlu0 %435 }
 0x59a   : > { %439 = vst.msk [vmem:[%s1126_s2] sm:$0xf] %vm438_vm5, %v436_v52 }
 0x5a1   : > { %v568_v53 = vpop.permute.xlu1 %567 }
 0x5a2   : > { %571 = vst.msk [vmem:[%s1126_s2] sm:$0xf] %vm570_vm6, %v568_v53 }
 0x5cd   : > { %v700_v54 = vpop.permute.xlu0 %699 }
 0x5ce   : > { %703 = vst.msk [vmem:[%s1126_s2] sm:$0xf] %vm702_vm7, %v700_v54 }
 0x5cf PF: > { %s11_s10 = sadd.s32 1, %s999_s10   ;;  %s1182_s6 = smov %s987_s7 }
 0x5d0   : > { %p8_p10 = scmp.ge.s32.totalorder %s11_s10, 4   ;;  %s1183_s7 = smov %s1054_s14 }
 0x5d1   : > { %s1184_s8 = smov %s995_s9  ;;  %s1185_s9 = smov %s1187_s11 }
 0x5d2   :  { %10 = sbr.rel (!%p8_p10) target bundleno = 3 (0x3), region = 102 }

</bundles_post_ra>
